<compile_context>
chip_gen: v5e
topology: v5e:2x2
jax: 0.10.0
libtpu: 0.0.40
codegen_flags: <defaults>
</compile_context>

<pallas_src>
import jax
import jax.numpy as jnp
from jax.experimental import pallas as pl
from jax.experimental.pallas import tpu as pltpu


_LANE = 128
_SUBLANE = 8


def _ceil8(x):
    return (x + _SUBLANE - 1) // _SUBLANE * _SUBLANE


def _round_up(x, m):
    return (x + m - 1) // m * m


def _vmem_budgets():
    """Generation-aware (tile_byte_budget, vmem_limit_bytes)."""
    try:
        vmem = int(pltpu.get_tpu_info().vmem_capacity_bytes)
    except Exception:
        vmem = 64 * 1024 * 1024  # conservative: assume the smallest (v7x per-TC)
    vmem_limit = min(vmem // 2, 64 * 1024 * 1024)       # 64 MiB on v5e/v6e, 32 MiB on v7x
    tile_budget = min((vmem * 3) // 8, 48 * 1024 * 1024)  # 48 MiB on v5e/v6e, 24 MiB on v7x
    return tile_budget, vmem_limit


def _per_lane_bytes(c_feat, xyz_itemsize, feat_itemsize, out_itemsize):
    """Bytes per output lane of double-buffered in+out blocks, incl. 8-sublane padding."""
    return 2 * (_ceil8(3) * xyz_itemsize
                + _ceil8(c_feat) * feat_itemsize
                + _ceil8(c_feat + 3) * out_itemsize)


def _pick_lane_tile(n, per_lane_bytes, budget):
    """Largest lane tile: either the full dim (always legal) or a multiple of 128."""
    max_lanes = (budget // max(per_lane_bytes, 1)) // _LANE * _LANE
    max_lanes = max(_LANE, max_lanes)
    if n <= max_lanes:
        return n          # full-dim block: legal for any n
    return max_lanes      # lane-dense multiple of 128 (last tile may be masked)


def _group_all_concat_kernel(xyz_ref, feat_ref, out_ref):
    # xyz_ref : (1, 3, tn)   feat_ref : (1, C, tn)   out_ref : (1, C+3, tn)
    # Two direct slice stores; no transpose, no concatenate materialization.
    out_ref[0, 0:3, :] = xyz_ref[0].astype(out_ref.dtype)
    out_ref[0, 3:, :] = feat_ref[0].astype(out_ref.dtype)


def group_all(xyz, new_xyz=None, features=None, use_xyz=True):
    """JAX/Pallas equivalent of GroupAll.forward.

    xyz:      (B, N, 3)
    new_xyz:  ignored (as in the PyTorch module)
    features: (B, C, N) or None
    returns:  (B, C+3, 1, N) if features is not None and use_xyz
              (B, C,   1, N) if features is not None and not use_xyz
              (B, 3,   1, N) if features is None
    """
    del new_xyz  # ignored, matching the reference module
    B, N, _ = xyz.shape

    if features is None:
        # Pure data movement: the transpose already materializes the answer;
        # a copy kernel would only double HBM traffic (perf review item 1).
        return jnp.transpose(xyz, (0, 2, 1)).reshape(B, 3, 1, N)

    C = features.shape[1]
    if not use_xyz:
        # Pure reshape (unsqueeze) — no data movement needed.
        return features.reshape(B, C, 1, N)

    out_dtype = jnp.promote_types(xyz.dtype, features.dtype)  # torch.cat promotion

    if N < _LANE:
        # Lane-sparse output: every store would be a masked vst.msk and per-step
        # overhead dominates — XLA's fused transpose+concat is at least as fast.
        xyz_t = jnp.transpose(xyz, (0, 2, 1)).astype(out_dtype)
        return jnp.concatenate(
            [xyz_t, features.astype(out_dtype)], axis=1).reshape(B, C + 3, 1, N)

    # Lane-dense layout for the coordinates: (B, 3, N).  This transpose touches
    # only 3*N elements per batch (tiny next to the C*N feature bytes) and lets
    # the kernel stream lane-dense tiles with zero XLU work.
    xyz_t = jnp.transpose(xyz, (0, 2, 1))

    tile_budget, vmem_limit = _vmem_budgets()
    per_lane = _per_lane_bytes(C,
                               jnp.dtype(xyz.dtype).itemsize,
                               jnp.dtype(features.dtype).itemsize,
                               jnp.dtype(out_dtype).itemsize)
    tn = _pick_lane_tile(N, per_lane, tile_budget)
    # v7x has 2 TensorCores: make sure the parallel grid has >= 2 balanced tiles
    # when B is small (harmless ~0.35 us extra step on single-TC chips).
    if B * pl.cdiv(N, tn) < 2 and N > _LANE:
        tn = min(tn, _round_up(pl.cdiv(N, 2), _LANE))
    grid = (B, pl.cdiv(N, tn))

    out = pl.pallas_call(
        _group_all_concat_kernel,
        out_shape=jax.ShapeDtypeStruct((B, C + 3, N), out_dtype),
        grid_spec=pltpu.PrefetchScalarGridSpec(
            num_scalar_prefetch=0,
            grid=grid,
            in_specs=[
                pl.BlockSpec((1, 3, tn), lambda b, j: (b, 0, j)),
                pl.BlockSpec((1, C, tn), lambda b, j: (b, 0, j)),
            ],
            out_specs=pl.BlockSpec((1, C + 3, tn), lambda b, j: (b, 0, j)),
        ),
        compiler_params=pltpu.CompilerParams(
            dimension_semantics=("parallel", "parallel"),
            vmem_limit_bytes=vmem_limit),
    )(xyz_t, features)
    return out.reshape(B, C + 3, 1, N)


if __name__ == "__main__":
    # GroupAll has no learned parameters (only the use_xyz flag).
    key = jax.random.PRNGKey(0)
    kx, kf, kx2, kf2 = jax.random.split(key, 4)

    # --- Pallas concat path (N >= 128 so the kernel is exercised) -------------
    B, N, C = 2, 256, 4
    xyz = jax.random.normal(kx, (B, N, 3), dtype=jnp.float32)       # (B, N, 3)
    features = jax.random.normal(kf, (B, C, N), dtype=jnp.float32)  # (B, C, N)

    out = group_all(xyz, new_xyz=None, features=features, use_xyz=True)
    out = jax.block_until_ready(out)

    grouped_xyz = jnp.transpose(xyz, (0, 2, 1))[:, :, None, :]       # (B, 3, 1, N)
    grouped_feat = features[:, :, None, :]                           # (B, C, 1, N)
    ref = jnp.concatenate([grouped_xyz, grouped_feat], axis=1)       # (B, C+3, 1, N)
    assert out.shape == (B, C + 3, 1, N), out.shape
    assert jnp.allclose(out, ref), "concat path mismatch vs reference"

    # --- use_xyz=False path (pure reshape) -----------------------------------
    out_nf = group_all(xyz, new_xyz=None, features=features, use_xyz=False)
    out_nf = jax.block_until_ready(out_nf)
    assert out_nf.shape == (B, C, 1, N)
    assert jnp.allclose(out_nf, grouped_feat), "use_xyz=False path mismatch"

    # --- xyz-only path (features=None) ----------------------------------------
    out_xyz = group_all(xyz, new_xyz=None, features=None, use_xyz=True)
    out_xyz = jax.block_until_ready(out_xyz)
    assert out_xyz.shape == (B, 3, 1, N), out_xyz.shape
    assert jnp.allclose(out_xyz, grouped_xyz), "xyz-only path mismatch"

    # --- small-N bypass path (N < 128) ----------------------------------------
    Bs, Ns, Cs = 2, 16, 4
    xyz_s = jax.random.normal(kx2, (Bs, Ns, 3), dtype=jnp.float32)
    feat_s = jax.random.normal(kf2, (Bs, Cs, Ns), dtype=jnp.float32)
    out_s = jax.block_until_ready(
        group_all(xyz_s, new_xyz=None, features=feat_s, use_xyz=True))
    ref_s = jnp.concatenate(
        [jnp.transpose(xyz_s, (0, 2, 1))[:, :, None, :], feat_s[:, :, None, :]], axis=1)
    assert out_s.shape == (Bs, Cs + 3, 1, Ns)
    assert jnp.allclose(out_s, ref_s), "small-N bypass mismatch"

    print("KERNEL_OK")
</pallas_src>

<mosaic_0001>
module attributes {stable_mosaic.version = 11 : i64} {
  func.func @_group_all_concat_kernel(%arg0: i32, %arg1: i32, %arg2: memref<1x3x256xf32, #tpu.memory_space<vmem>>, %arg3: memref<1x4x256xf32, #tpu.memory_space<vmem>>, %arg4: memref<1x7x256xf32, #tpu.memory_space<vmem>>) attributes {dimension_semantics = [#tpu.dimension_semantics<parallel>, #tpu.dimension_semantics<parallel>], iteration_bounds = array<i64: 2, 1>, scalar_prefetch = 0 : i64, scratch_operands = 0 : i64, tpu.core_type = #tpu.core_type<tc>, window_params = [{transform_indices = @transform_0, window_bounds = array<i64: 1, 3, 256>}, {transform_indices = @transform_1, window_bounds = array<i64: 1, 4, 256>}, {transform_indices = @transform_2, window_bounds = array<i64: 1, 7, 256>}]} {
    %c0 = arith.constant 0 : index
    %c0_0 = arith.constant 0 : index
    %c0_1 = arith.constant 0 : index
    %0 = vector.load %arg2[%c0, %c0_0, %c0_1] : memref<1x3x256xf32, #tpu.memory_space<vmem>>, vector<1x3x256xf32>
    %1 = vector.shape_cast %0 : vector<1x3x256xf32> to vector<3x256xf32>
    %c0_2 = arith.constant 0 : index
    %c0_3 = arith.constant 0 : index
    %c0_4 = arith.constant 0 : index
    %2 = vector.load %arg4[%c0_2, %c0_3, %c0_4] : memref<1x7x256xf32, #tpu.memory_space<vmem>>, vector<1x3x256xf32>
    %3 = vector.shape_cast %2 : vector<1x3x256xf32> to vector<3x256xf32>
    %4 = vector.shape_cast %1 : vector<3x256xf32> to vector<1x3x256xf32>
    tpu.vector_store %arg4[%c0_2, %c0_3, %c0_4], %4 {strides = array<i32>} : memref<1x7x256xf32, #tpu.memory_space<vmem>>, vector<1x3x256xf32>,
    %c0_5 = arith.constant 0 : index
    %c0_6 = arith.constant 0 : index
    %c0_7 = arith.constant 0 : index
    %5 = vector.load %arg3[%c0_5, %c0_6, %c0_7] : memref<1x4x256xf32, #tpu.memory_space<vmem>>, vector<1x4x256xf32>
    %6 = vector.shape_cast %5 : vector<1x4x256xf32> to vector<4x256xf32>
    %c0_8 = arith.constant 0 : index
    %c3 = arith.constant 3 : index
    %c0_9 = arith.constant 0 : index
    %7 = vector.load %arg4[%c0_8, %c3, %c0_9] : memref<1x7x256xf32, #tpu.memory_space<vmem>>, vector<1x4x256xf32>
    %8 = vector.shape_cast %7 : vector<1x4x256xf32> to vector<4x256xf32>
    %9 = vector.shape_cast %6 : vector<4x256xf32> to vector<1x4x256xf32>
    tpu.vector_store %arg4[%c0_8, %c3, %c0_9], %9 {strides = array<i32>} : memref<1x7x256xf32, #tpu.memory_space<vmem>>, vector<1x4x256xf32>,
    return
  }
  func.func @transform_0(%arg0: i32, %arg1: i32) -> (i32, i32, i32) {
    %c0_i32 = arith.constant 0 : i32
    %c0_i32_0 = arith.constant 0 : i32
    return %arg0, %c0_i32, %arg1 : i32, i32, i32
  }
  func.func @transform_1(%arg0: i32, %arg1: i32) -> (i32, i32, i32) {
    %c0_i32 = arith.constant 0 : i32
    %c0_i32_0 = arith.constant 0 : i32
    return %arg0, %c0_i32, %arg1 : i32, i32, i32
  }
  func.func @transform_2(%arg0: i32, %arg1: i32) -> (i32, i32, i32) {
    %c0_i32 = arith.constant 0 : i32
    %c0_i32_0 = arith.constant 0 : i32
    return %arg0, %c0_i32, %arg1 : i32, i32, i32
  }
}

</mosaic_0001>

<bundles_post_ra>
// kernel: tpu_custom_call.1
= control target key start
LH: loop header
LB: loop body
LE: loop exit
PB: predicated region body
PF: predicated region fallthrough
CT: control target
= control target key end

     0   :  { %s423_s9 = smov 0   ;;  %s425_s10 = smov 0   ;;  %s456_s0 = inlined_call_operand.vmem [shape: f32[2,3,256], index: 0, kind: input, shape index: {}]   ;;  %s457_s1 = inlined_call_operand.vmem [shape: f32[2,4,256], index: 1, kind: input, shape index: {}]   ;;  %s458_s2 = inlined_call_operand.vmem [shape: f32[2,7,256], index: 2, kind: output, shape index: {}]  }
   0x1   :  { %s427_s11 = smov 0  }
   0x2 LB: > { %s24_s12 = sadd.s32 1, %s402_s10  ;;  %p348_p0 = scmp.ge.s32.totalorder %s406_s11, 1  ;;  %s406_s11 = sphi %s427_s11, %s12_s11   ;;  %s402_s10 = sphi %s425_s10, %s460_s10   ;;  %s398_s9 = sphi %s423_s9, %s459_s9  }
   0x3   : > { %p26_p1 = scmp.ge.s32.totalorder %s24_s12, 2  ;;  %p150_p2 = scmp.lt.s32.totalorder %s406_s11, 3 }
   0x5   : > { %s462_s12 = smov (%p26_p1, %s24_s12), 0  ;;  %p151_p3 = pnand %p348_p0, %p150_p2 }
   0x6   : > { %p190_p4 = scmp.lt.s32.totalorder (!%p151_p3), %s398_s9, 1 }
   0x7   : > { %154 = sbr.rel (%p151_p3) target bundleno = 38 (0x26), region = 28 }
   0xc   : > { %s464_s9 = smov (!%p190_p4, %s398_s9), 1 }
   0xd   : > { %s357_s13 = sshll.u32 %s464_s9, 3  ;;  %s359_s17 = sshll.u32 %s464_s9, 4 }
   0xe   : > { %s197_s16 = scalar_lea.vmem %s456_s0, %s357_s13  ;;  %s207_s20 = scalar_lea.vmem %s457_s1, %s357_s13 }
   0xf   : > { %v219_v0 = vld [vmem:[%s197_s16] sm:$0x77]  ;;  %s217_s23 = scalar_lea.vmem %s458_s2, %s359_s17 }
  0x10   : > { %221 = vst [vmem:[#allocation1] ss:$2 sm:$0xff] %v219_v0  ;;  %v228_v1 = vld [vmem:[%s207_s20] sm:$0xff] }
  0x17   : > { %v222_v2 = vld.sshfl [vmem:[#allocation1] sm:$0xff pattern:$0x75316420]  ;;  %v223_v3 = vld.sshfl [vmem:[#allocation1 + $0x8] sm:$0xff pattern:$0x75316420] }
  0x18   : > { %226 = vst [vmem:[%s217_s23] sm:$0x7] %v222_v2 }
  0x19   : > { %227 = vst [vmem:[%s217_s23 + $0x8] sm:$0x7] %v223_v3 }
  0x1a   : > { %230 = vst [vmem:[#allocation1] ss:$2 sm:$0xff] %v228_v1 }
  0x21   : > { %v231_v4 = vld.sshfl [vmem:[#allocation1] sm:$0xff pattern:$0x75316420]  ;;  %v232_v5 = vld.sshfl [vmem:[#allocation1 + $0x8] sm:$0xff pattern:$0x75316420] }
  0x22   : > { %v233_v6 = vrot.slane %v231_v4, 5  ;;  %v234_v7 = vrot.slane %v232_v5, 5 }
  0x24   : > { %237 = vst [vmem:[%s217_s23] sm:$0x78] %v233_v6 }
  0x25   : > { %238 = vst [vmem:[%s217_s23 + $0x8] sm:$0x78] %v234_v7 }
  0x26 PF: > { %s12_s11 = sadd.s32 1, %s406_s11   ;;  %s459_s9 = smov %s402_s10 }
  0x27   : > { %p9_p5 = scmp.ge.s32.totalorder %s12_s11, 4   ;;  %s460_s10 = smov %s462_s12 }
  0x29   :  { %11 = sbr.rel (!%p9_p5) target bundleno = 2 (0x2), region = 61 }

</bundles_post_ra>
